<compile_context>
chip_gen: v5e
topology: v5e:2x2
jax: 0.10.0
libtpu: 0.0.40
codegen_flags: <defaults>
</compile_context>

<pallas_src>
import jax
import jax.numpy as jnp
from jax.experimental import pallas as pl
from jax.experimental.pallas import tpu as pltpu


def spatial_block_kernel(x_ref, wconv_ref, bconv_ref, w1_ref, w2_ref, o_ref):
    # x_ref:     (Bt, C, HW)  VMEM  -- Bt fused batch elements
    # wconv_ref: (1, C)       VMEM  -- 1x1 conv weight (out_channels = 1), resident
    # bconv_ref: (1,)         SMEM  -- 1x1 conv bias (scalar)
    # w1_ref:    (HW, R)      VMEM  -- first Linear (no bias), transposed, resident
    # w2_ref:    (R, HW)      VMEM  -- second Linear (no bias), transposed, resident
    # o_ref:     (Bt, C, HW)  VMEM
    bt = x_ref.shape[0]

    # --- 1x1 conv: per-pixel channel reduction on the MXU.  One (1,C)@(C,HW)
    # dot per fused batch row; bt is a small static constant, and rank-2 dots
    # are the most robust Mosaic lowering path (no (Bt,C,HW) product temp,
    # no cross-sublane reduce).  The tiny conv weight is cast to x's dtype so
    # the big x operand is never upcast.
    wc = wconv_ref[...].astype(x_ref.dtype)                         # (1, C), tiny
    rows = [
        jnp.dot(wc, x_ref[i], preferred_element_type=jnp.float32)   # (1, HW)
        for i in range(bt)
    ]
    y = (rows[0] if bt == 1 else jnp.concatenate(rows, axis=0))
    y = y + bconv_ref[0]                                            # (Bt, HW) f32

    # --- fc_: Linear -> ReLU -> Linear -> Sigmoid, batched over the fused rows.
    # Only the small activations are cast to the weight dtype; weights are fed
    # to the MXU in their native dtype with f32 accumulation.
    h = jnp.maximum(
        jnp.dot(y.astype(w1_ref.dtype), w1_ref[...],
                preferred_element_type=jnp.float32),
        0.0,
    )                                                               # (Bt, R)
    gate = jax.nn.sigmoid(
        jnp.dot(h.astype(w2_ref.dtype), w2_ref[...],
                preferred_element_type=jnp.float32)
    )                                                               # (Bt, HW) f32

    # --- Gating multiply in the input dtype: broadcast gate over channels,
    # re-read x_ref (no long-lived f32 copy of the big block).
    o_ref[...] = (x_ref[...] * gate[:, None, :].astype(x_ref.dtype)).astype(o_ref.dtype)


def spatial_block(x, wconv, bconv, w1, w2):
    """x: (B, C, H, W) NCHW; wconv: (1, C); bconv: (1,); w1: (HW, R); w2: (R, HW)."""
    b, c, h, w = x.shape
    hw = h * w
    r = w1.shape[1]

    # Free, layout-preserving reshape (merge H,W) -- no extra HBM pass.
    x3 = x.reshape(b, c, hw)

    itemsize = jnp.dtype(x.dtype).itemsize
    per_elem = c * hw * itemsize

    # Fuse batch elements per grid step: aim for ~1 MiB x blocks, keep >= 2
    # grid steps when possible (v7x megacore), cap the fused count (the conv is
    # unrolled per fused row).  bt always divides b, so no edge blocks.
    target_bytes = 1 << 20
    max_fuse = 16
    bt = 1
    for d in range(1, b + 1):
        if b % d != 0 or d > max_fuse:
            continue
        if d * per_elem > target_bytes:
            continue
        if b >= 2 and b // d < 2:
            continue
        bt = d
    grid_b = b // bt
    blk_bytes = bt * per_elem

    # Deeper input buffering only pays off when blocks are small and the grid
    # is long (v5e: lower HBM BW, exposed per-step DMA latency).
    deep_input = grid_b >= 4 and blk_bytes <= (256 << 10)
    x_mode = pl.Buffered(3) if deep_input else None
    x_bufs = 3 if deep_input else 2

    # VMEM budget: x buffers + double-buffered output + single-buffered
    # resident weights + small f32 activation temps, with slack.  Cap against
    # the actual chip's VMEM (v7x: 64 MiB, v5e/v6e: 128 MiB).
    w_itemsize = jnp.dtype(w1.dtype).itemsize
    weight_bytes = (c + hw * r + r * hw) * w_itemsize
    temp_bytes = bt * (3 * hw + r) * 4
    est = (x_bufs + 2) * blk_bytes + weight_bytes + temp_bytes + (2 << 20)
    try:
        vmem_cap = pltpu.get_tpu_info().vmem_capacity_bytes
    except Exception:
        vmem_cap = 64 << 20  # conservative (v7x) fallback
    vmem_limit = int(min(max(est, 8 << 20), int(vmem_cap * 0.9)))

    out3 = pl.pallas_call(
        spatial_block_kernel,
        out_shape=jax.ShapeDtypeStruct((b, c, hw), x.dtype),
        grid=(grid_b,),
        in_specs=[
            # x: streamed per fused-batch block (full C, HW extents -> the
            # (8,128) divisibility rule is satisfied by "equals full dim").
            pl.BlockSpec((bt, c, hw), lambda i: (i, 0, 0), pipeline_mode=x_mode),
            # Loop-invariant weights: constant index map + single buffer.
            pl.BlockSpec((1, c), lambda i: (0, 0), pipeline_mode=pl.Buffered(1)),
            # Conv bias scalar lives in SMEM.
            pl.BlockSpec(memory_space=pltpu.MemorySpace.SMEM),
            pl.BlockSpec((hw, r), lambda i: (0, 0), pipeline_mode=pl.Buffered(1)),
            pl.BlockSpec((r, hw), lambda i: (0, 0), pipeline_mode=pl.Buffered(1)),
        ],
        out_specs=pl.BlockSpec((bt, c, hw), lambda i: (i, 0, 0)),
        compiler_params=pltpu.CompilerParams(
            dimension_semantics=("parallel",),
            vmem_limit_bytes=vmem_limit,
        ),
    )(x3, wconv, bconv, w1, w2)

    # Free reshape back to NCHW -- no slicing pass.
    return out3.reshape(b, c, h, w)


def reference(x, wconv, bconv, w1, w2):
    b, c, h, w = x.shape
    y = jnp.einsum("bchw,c->bhw", x, wconv[0]) + bconv[0]
    y = y.reshape(b, h * w)
    y = jax.nn.sigmoid(jnp.maximum(y @ w1, 0.0) @ w2)
    return x * y.reshape(b, 1, h, w)


if __name__ == "__main__":
    B, C, H, W = 2, 4, 16, 16
    HW = H * W
    REDUCTION = 64  # module default is 512; small value for the small test shape

    key = jax.random.PRNGKey(0)
    kx, kw, kb, k1, k2 = jax.random.split(key, 5)

    x = jax.random.normal(kx, (B, C, H, W), dtype=jnp.float32)
    # Conv2d(C, 1, kernel_size=1): weight (1, C, 1, 1) -> (1, C), bias (1,)
    wconv = jax.random.normal(kw, (1, C), dtype=jnp.float32) * 0.5
    bconv = jax.random.normal(kb, (1,), dtype=jnp.float32) * 0.1
    # Linear(HW, REDUCTION, bias=False), stored transposed -> (HW, REDUCTION)
    w1 = jax.random.normal(k1, (HW, REDUCTION), dtype=jnp.float32) * (1.0 / HW ** 0.5)
    # Linear(REDUCTION, HW, bias=False), stored transposed -> (REDUCTION, HW)
    w2 = jax.random.normal(k2, (REDUCTION, HW), dtype=jnp.float32) * (1.0 / REDUCTION ** 0.5)

    out = jax.block_until_ready(spatial_block(x, wconv, bconv, w1, w2))
    ref = reference(x, wconv, bconv, w1, w2)

    assert out.shape == (B, C, H, W)
    assert jnp.allclose(out, ref, atol=1e-4, rtol=1e-4), "mismatch vs JAX reference"

    print("KERNEL_OK")
</pallas_src>

<mosaic_0001>
module attributes {stable_mosaic.version = 11 : i64} {
  func.func @spatial_block_kernel(%arg0: i32, %arg1: memref<1x4x256xf32, #tpu.memory_space<vmem>>, %arg2: memref<1x4xf32, #tpu.memory_space<vmem>>, %arg3: memref<1xf32, #tpu.memory_space<smem>>, %arg4: memref<256x64xf32, #tpu.memory_space<vmem>>, %arg5: memref<64x256xf32, #tpu.memory_space<vmem>>, %arg6: memref<1x4x256xf32, #tpu.memory_space<vmem>>) attributes {dimension_semantics = [#tpu.dimension_semantics<parallel>], iteration_bounds = array<i64: 2>, scalar_prefetch = 0 : i64, scratch_operands = 0 : i64, tpu.core_type = #tpu.core_type<tc>, window_params = [{transform_indices = @transform_0, window_bounds = array<i64: 1, 4, 256>}, {pipeline_mode = #tpu.pipeline_mode<synchronous>, transform_indices = @transform_1, window_bounds = array<i64: 1, 4>}, {transform_indices = @transform_2, window_bounds = array<i64: 1>}, {pipeline_mode = #tpu.pipeline_mode<synchronous>, transform_indices = @transform_3, window_bounds = array<i64: 256, 64>}, {pipeline_mode = #tpu.pipeline_mode<synchronous>, transform_indices = @transform_4, window_bounds = array<i64: 64, 256>}, {transform_indices = @transform_5, window_bounds = array<i64: 1, 4, 256>}]} {
    %c0 = arith.constant 0 : index
    %c0_0 = arith.constant 0 : index
    %0 = vector.load %arg2[%c0, %c0_0] : memref<1x4xf32, #tpu.memory_space<vmem>>, vector<1x4xf32>
    %c0_1 = arith.constant 0 : index
    %c0_2 = arith.constant 0 : index
    %c0_3 = arith.constant 0 : index
    %1 = vector.load %arg1[%c0_1, %c0_2, %c0_3] : memref<1x4x256xf32, #tpu.memory_space<vmem>>, vector<1x4x256xf32>
    %2 = vector.shape_cast %1 : vector<1x4x256xf32> to vector<4x256xf32>
    %cst = arith.constant dense<0.000000e+00> : vector<1x256xf32>
    %3 = tpu.matmul %0, %2, %cst {dimension_numbers = #tpu.dot_dimension_numbers<[1], [0], [0], [1], [0, 0, 1, 1], [], []>} : vector<1x4xf32>, vector<4x256xf32>, vector<1x256xf32> -> vector<1x256xf32>
    %c0_4 = arith.constant 0 : index
    %4 = memref.load %arg3[%c0_4] : memref<1xf32, #tpu.memory_space<smem>>
    %5 = vector.broadcast %4 : f32 to vector<1x256xf32>
    %6 = arith.addf %3, %5 : vector<1x256xf32>
    %c0_5 = arith.constant 0 : index
    %c0_6 = arith.constant 0 : index
    %7 = vector.load %arg4[%c0_5, %c0_6] : memref<256x64xf32, #tpu.memory_space<vmem>>, vector<256x64xf32>
    %cst_7 = arith.constant dense<0.000000e+00> : vector<1x64xf32>
    %8 = tpu.matmul %6, %7, %cst_7 {dimension_numbers = #tpu.dot_dimension_numbers<[1], [0], [0], [1], [0, 0, 1, 1], [], []>} : vector<1x256xf32>, vector<256x64xf32>, vector<1x64xf32> -> vector<1x64xf32>
    %cst_8 = arith.constant 0.000000e+00 : f32
    %9 = vector.broadcast %cst_8 : f32 to vector<1x64xf32>
    %10 = arith.maximumf %8, %9 : vector<1x64xf32>
    %c0_9 = arith.constant 0 : index
    %c0_10 = arith.constant 0 : index
    %11 = vector.load %arg5[%c0_9, %c0_10] : memref<64x256xf32, #tpu.memory_space<vmem>>, vector<64x256xf32>
    %cst_11 = arith.constant dense<0.000000e+00> : vector<1x256xf32>
    %12 = tpu.matmul %10, %11, %cst_11 {dimension_numbers = #tpu.dot_dimension_numbers<[1], [0], [0], [1], [0, 0, 1, 1], [], []>} : vector<1x64xf32>, vector<64x256xf32>, vector<1x256xf32> -> vector<1x256xf32>
    %13 = arith.negf %12 : vector<1x256xf32>
    %14 = math.exp %13 : vector<1x256xf32>
    %cst_12 = arith.constant 1.000000e+00 : f32
    %15 = vector.broadcast %cst_12 : f32 to vector<1x256xf32>
    %16 = arith.addf %15, %14 : vector<1x256xf32>
    %17 = arith.divf %15, %16 : vector<1x256xf32>
    %c0_13 = arith.constant 0 : index
    %c0_14 = arith.constant 0 : index
    %c0_15 = arith.constant 0 : index
    %18 = vector.load %arg1[%c0_13, %c0_14, %c0_15] : memref<1x4x256xf32, #tpu.memory_space<vmem>>, vector<1x4x256xf32>
    %19 = vector.shape_cast %17 : vector<1x256xf32> to vector<1x1x256xf32>
    %20 = vector.broadcast %19 : vector<1x1x256xf32> to vector<1x4x256xf32>
    %21 = arith.mulf %18, %20 : vector<1x4x256xf32>
    %c0_16 = arith.constant 0 : index
    %c0_17 = arith.constant 0 : index
    %c0_18 = arith.constant 0 : index
    %22 = vector.load %arg6[%c0_16, %c0_17, %c0_18] : memref<1x4x256xf32, #tpu.memory_space<vmem>>, vector<1x4x256xf32>
    tpu.vector_store %arg6[%c0_16, %c0_17, %c0_18], %21 {strides = array<i32>} : memref<1x4x256xf32, #tpu.memory_space<vmem>>, vector<1x4x256xf32>,
    return
  }
  func.func @transform_0(%arg0: i32) -> (i32, i32, i32) {
    %c0_i32 = arith.constant 0 : i32
    %c0_i32_0 = arith.constant 0 : i32
    %c0_i32_1 = arith.constant 0 : i32
    return %arg0, %c0_i32, %c0_i32_0 : i32, i32, i32
  }
  func.func @transform_1(%arg0: i32) -> (i32, i32) {
    %c0_i32 = arith.constant 0 : i32
    %c0_i32_0 = arith.constant 0 : i32
    %c0_i32_1 = arith.constant 0 : i32
    return %c0_i32, %c0_i32_0 : i32, i32
  }
  func.func @transform_2(%arg0: i32) -> i32 {
    %c0_i32 = arith.constant 0 : i32
    %c0_i32_0 = arith.constant 0 : i32
    return %c0_i32 : i32
  }
  func.func @transform_3(%arg0: i32) -> (i32, i32) {
    %c0_i32 = arith.constant 0 : i32
    %c0_i32_0 = arith.constant 0 : i32
    %c0_i32_1 = arith.constant 0 : i32
    return %c0_i32, %c0_i32_0 : i32, i32
  }
  func.func @transform_4(%arg0: i32) -> (i32, i32) {
    %c0_i32 = arith.constant 0 : i32
    %c0_i32_0 = arith.constant 0 : i32
    %c0_i32_1 = arith.constant 0 : i32
    return %c0_i32, %c0_i32_0 : i32, i32
  }
  func.func @transform_5(%arg0: i32) -> (i32, i32, i32) {
    %c0_i32 = arith.constant 0 : i32
    %c0_i32_0 = arith.constant 0 : i32
    %c0_i32_1 = arith.constant 0 : i32
    return %arg0, %c0_i32, %c0_i32_0 : i32, i32, i32
  }
}

</mosaic_0001>

<bundles_post_ra>
// kernel: tpu_custom_call.1
= control target key start
LH: loop header
LB: loop body
LE: loop exit
PB: predicated region body
PF: predicated region fallthrough
CT: control target
= control target key end

     0   :  { %s946_s0 = inlined_call_operand.vmem [shape: f32[2,4,256], index: 0, kind: input, shape index: {}]   ;;  %s947_s1 = inlined_call_operand.vmem [shape: f32[1,4], index: 1, kind: input, shape index: {}]   ;;  %s948_s2 = inlined_call_operand.<no memory space> [shape: f32[1], index: 2, kind: input, shape index: {}]   ;;  %s949_s3 = inlined_call_operand.vmem [shape: f32[256,64], index: 3, kind: input, shape index: {}]   ;;  %s950_s4 = inlined_call_operand.vmem [shape: f32[64,256], index: 4, kind: input, shape index: {}]   ;;  %s951_s5 = inlined_call_operand.hbm [shape: f32[2,4,256], index: 5, kind: output, shape index: {}]  }
   0x1   :  { %10 = sst [smem:[#allocation2]] %s948_s2 }
   0x2   :  { %11 = vsyncpa [#allocation4], 0 }
   0x3   :  { %13 = vsyncpa [#allocation4 + $0x1], 0  ;;  %s703_s20 = smov 0   ;;  %s705_s21 = smov 0  }
   0x4   :  { %s707_s22 = smov 0   ;;  %s709_s23 = smov 0  }
   0x5 LB: > { %s724_s2 = sadd.s32 4294967295, %s668_s23   ;;  %s537_s24 = sadd.s32 4294967294, %s668_s23   ;;  %s668_s23 = sphi %s709_s23, %s957_s23   ;;  %s664_s22 = sphi %s707_s22, %s956_s22   ;;  %s660_s21 = sphi %s705_s21, %s955_s21   ;;  %s656_s20 = sphi %s703_s20, %s954_s20  }
   0x6   : > { %s728_s25 = sadd.s32 1, %s668_s23   ;;  %s136_s26 = sadd.s32 1, %s664_s22 }
   0x7   : > { %s133_s27 = ssub.s32 %s668_s23, %s728_s25  ;;  %p146_p0 = scmp.ne.s32.totalorder %s664_s22, %s660_s21 }
   0x8   : > { %p134_p1 = scmp.eq.s32.totalorder %s133_s27, 0  ;;  %p147_p2 = scmp.eq.s32.totalorder %s724_s2, 1 }
   0x9   : > { %p152_p3 = scmp.ne.s32.totalorder %s660_s21, %s656_s20  ;;  %p153_p4 = scmp.eq.s32.totalorder %s537_s24, 1 }
   0xa   : > { %s739_s28 = scalar_select %p134_p1, %s664_s22, %s136_s26  }
   0xb   : > { %p741_p5 = por %p147_p2, %p146_p0  ;;  %p745_p6 = por %p153_p4, %p152_p3 }
   0xc   : > { %p540_p7 = scmp.ge.s32.totalorder %s668_s23, 1  ;;  %p191_p8 = scmp.lt.s32.totalorder %s668_s23, 3 }
   0xe   : > { %p192_p9 = pnand %p540_p7, %p191_p8 }
   0xf   : > { %p219_p10 = scmp.lt.s32.totalorder (!%p192_p9), %s724_s2, 1  ;;  %s226_s12 = sld [smem:[#allocation2]] (!%p192_p9) }
  0x10   : > { %195 = sbr.rel (%p192_p9) target bundleno = 465 (0x1d1), region = 40  ;;  %s216_s8 = sand.u32 (!%p192_p9), 1, %s660_s21  }
  0x11   : > { %s541_s9 = sshll.u32 (!%p192_p9), %s216_s8, 3  ;;  %s558_s10 = sshll.u32 (!%p192_p9), %s724_s2, 3 }
  0x12   : > { %s473_s13 = scalar_lea.hbm (!%p192_p9), %s951_s5, %s558_s10  ;;  %s462_s16 = scalar_lea.sflag (!%p192_p9), [#allocation4], %s216_s8 }
  0x13   : > { %s477_s15 = sshll.u32 (!%p192_p9), %s473_s13, 4  ;;  %s626_s26 = scalar_lea.hbm (!%p192_p9), %s951_s5, 16  ;;  %s478_s15 = int_to_ptr.hbm [resolvable:$true] %s477_s15 }
  0x14   : > { %s620_s17 = sshra.s32 (!%p192_p9), %s478_s15, 4  ;;  %s621_s17 = int_to_ptr.hbm [resolvable:$true] %s620_s17 }
  0x15   : > { %v296_v0 = vld [vmem:[%s949_s3 + $0x78] sm:$0xff]  ;;  %v295_v2 = vld [vmem:[%s949_s3 + $0x70] sm:$0xff]  ;;  %s220_s14 = scalar_select %p219_p10, %s724_s2, 1  ;;  %v294_v4 = vld [vmem:[%s949_s3 + $0x68] sm:$0xff]  ;;  %vm236_vm0 = vcmask 1043456   ;;  %vm232_vm1 = vcmask 31744   ;;  %v227_v46 = vstv %s226_s12 }
  0x16   : > { %313 = vmatpush.msra.mxu2 %v296_v0  ;;  %v312_v1 = vld [vmem:[%s949_s3 + $0xf8] sm:$0xff]  ;;  %v311_v3 = vld [vmem:[%s949_s3 + $0xf0] sm:$0xff]  ;;  %v310_v5 = vld [vmem:[%s949_s3 + $0xe8] sm:$0xff]  ;;  %vm370_vm2 = vcmask 523264   ;;  %s622_s18 = scalar_lea.hbm %s621_s17, 8  ;;  %p627_p0 = scmp.lt.s32.totalorder %s621_s17, %s951_s5 }
  0x17   : > { %333 = vmatpush.msra.mxu3 %v312_v1  ;;  %s557_s19 = sshll.u32 %s220_s14, 3  ;;  %v293_v6 = vld [vmem:[%s949_s3 + $0x60] sm:$0xff]  ;;  %v292_v9 = vld [vmem:[%s949_s3 + $0x58] sm:$0xff]  ;;  %v291_v11 = vld [vmem:[%s949_s3 + $0x50] sm:$0xff]  ;;  %s218_s14 = scalar_lea.vmem [#allocation3], %s541_s9 }
  0x18   : > { %314 = vmatpush.msra.mxu2 %v295_v2  ;;  %s223_s7 = scalar_lea.vmem %s946_s0, %s557_s19  ;;  %v309_v7 = vld [vmem:[%s949_s3 + $0xe0] sm:$0xff]  ;;  %v308_v10 = vld [vmem:[%s949_s3 + $0xd8] sm:$0xff]  ;;  %v307_v12 = vld [vmem:[%s949_s3 + $0xd0] sm:$0xff]  ;;  %s475_s2 = sshll.u32 %s218_s14, 4  ;;  %s476_s2 = int_to_ptr.vmem [resolvable:$true] %s475_s2 }
  0x19   : > { %334 = vmatpush.msra.mxu3 %v311_v3  ;;  %v780_v8 = vld [vmem:[%s223_s7] sm:$0xff]  ;;  %v290_v13 = vld [vmem:[%s949_s3 + $0x48] sm:$0xff]  ;;  %v288_v20 = vld [vmem:[%s949_s3 + $0x38] sm:$0xff]  ;;  %p623_p11 = scmp.ne.s32.totalorder %s621_s17, %s622_s18  ;;  %p628_p1 = scmp.lt.s32.totalorder %s626_s26, %s622_s18 }
  0x1a   : > { %315 = vmatpush.msra.mxu2 %v294_v4  ;;  %229 = vst [vmem:[#allocation1] ss:$2 sm:$0xff] %v780_v8  ;;  %v306_v14 = vld [vmem:[%s949_s3 + $0xc8] sm:$0xff]  ;;  %v224_v15 = vld [vmem:[%s947_s1] sm:$0x1]  ;;  %v304_v21 = vld [vmem:[%s949_s3 + $0xb8] sm:$0xff] }
  0x1b   : > { %335 = vmatpush.msra.mxu3 %v310_v5  ;;  %v289_v16 = vld [vmem:[%s949_s3 + $0x40] sm:$0xff]  ;;  %v287_v22 = vld [vmem:[%s949_s3 + $0x30] sm:$0xff]  ;;  %v286_v24 = vld [vmem:[%s949_s3 + $0x28] sm:$0xff]  ;;  %p624_p12 = pnand %p623_p11, %p741_p5  ;;  %p629_p2 = por %p628_p1, %p627_p0 }
  0x1c   : > { %316 = vmatpush.msra.mxu2 %v293_v6  ;;  %v305_v17 = vld [vmem:[%s949_s3 + $0xc0] sm:$0xff]  ;;  %v303_v23 = vld [vmem:[%s949_s3 + $0xb0] sm:$0xff]  ;;  %v302_v25 = vld [vmem:[%s949_s3 + $0xa8] sm:$0xff] }
  0x1d   : > { %336 = vmatpush.msra.mxu3 %v309_v7  ;;  %v285_v26 = vld [vmem:[%s949_s3 + $0x20] sm:$0xff]  ;;  %v284_v28 = vld [vmem:[%s949_s3 + $0x18] sm:$0xff]  ;;  %v283_v30 = vld [vmem:[%s949_s3 + $0x10] sm:$0xff]  ;;  %p625_p13 = pneg %p624_p12 }
  0x1e   : > { %317 = vmatpush.msra.mxu2 %v292_v9  ;;  %v301_v27 = vld [vmem:[%s949_s3 + $0xa0] sm:$0xff]  ;;  %v300_v29 = vld [vmem:[%s949_s3 + $0x98] sm:$0xff]  ;;  %v299_v31 = vld [vmem:[%s949_s3 + $0x90] sm:$0xff] }
  0x1f   : > { %337 = vmatpush.msra.mxu3 %v308_v10  ;;  %v282_v32 = vld [vmem:[%s949_s3 + $0x8] sm:$0xff]  ;;  %v281_v34 = vld [vmem:[%s949_s3] sm:$0xff]  ;;  %v368_v36 = vld [vmem:[%s950_s4 + $0x70] sm:$0xff]  ;;  %p630_p3 = pnand %p629_p2, %p625_p13 }
  0x20   : > { %318 = vmatpush.msra.mxu2 %v291_v11  ;;  %v298_v33 = vld [vmem:[%s949_s3 + $0x88] sm:$0xff]  ;;  %v297_v35 = vld [vmem:[%s949_s3 + $0x80] sm:$0xff]  ;;  %v369_v37 = vld [vmem:[%s950_s4 + $0x78] sm:$0xff] }
  0x21   : > { %338 = vmatpush.msra.mxu3 %v307_v12  ;;  %v230_v18 = vld.sshfl [vmem:[#allocation1] sm:$0xff pattern:$0x75316420]  ;;  %v231_v19 = vld.sshfl [vmem:[#allocation1 + $0x8] sm:$0xff pattern:$0x75316420] }
  0x22   : > { %319 = vmatpush.msra.mxu2 %v290_v13  ;;  %544 = vmatpush.msk.msra.mxu0 %vm236_vm0, %v230_v18  ;;  %v366_v38 = vld [vmem:[%s950_s4 + $0x60] sm:$0xff]  ;;  %v367_v39 = vld [vmem:[%s950_s4 + $0x68] sm:$0xff]  ;;  %v364_v40 = vld [vmem:[%s950_s4 + $0x50] sm:$0xff] }
  0x23   : > { %339 = vmatpush.msra.mxu3 %v306_v14  ;;  %546 = vmatpush.msk.msra.mxu1 %vm236_vm0, %v231_v19  ;;  %v365_v41 = vld [vmem:[%s950_s4 + $0x58] sm:$0xff]  ;;  %v362_v42 = vld [vmem:[%s950_s4 + $0x40] sm:$0xff]  ;;  %v363_v43 = vld [vmem:[%s950_s4 + $0x48] sm:$0xff] }
  0x24   : > { %545 = vmatmul.msk.f32.vlgmr.msra.gmra.mxu0 %vm232_vm1, %v224_v15  ;;  %547 = vmatmul.msk.f32.vlgmr.msra.gmra.mxu1 %vm232_vm1, %v224_v15  ;;  %v360_v44 = vld [vmem:[%s950_s4 + $0x30] sm:$0xff]  ;;  %v361_v45 = vld [vmem:[%s950_s4 + $0x38] sm:$0xff]  ;;  %v358_v51 = vld [vmem:[%s950_s4 + $0x20] sm:$0xff] }
  0x25   : > { %320 = vmatpush.msra.mxu2 %v289_v16  ;;  %340 = vmatpush.msra.mxu3 %v305_v17  ;;  %v359_v52 = vld [vmem:[%s950_s4 + $0x28] sm:$0xff]  ;;  %v356_v53 = vld [vmem:[%s950_s4 + $0x10] sm:$0xff]  ;;  %v357_v54 = vld [vmem:[%s950_s4 + $0x18] sm:$0xff] }
  0x26   : > { %382 = vmatpush.msrb.mxu0 %v368_v36  ;;  %402 = vmatpush.msrb.mxu1 %v369_v37  ;;  %v354_v55 = vld [vmem:[%s950_s4] sm:$0xff]  ;;  %v355_v56 = vld [vmem:[%s950_s4 + $0x8] sm:$0xff] }
  0x27   : > { %321 = vmatpush.msra.mxu2 %v288_v20  ;;  %341 = vmatpush.msra.mxu3 %v304_v21 }
  0x28   : > { %383 = vmatpush.msrb.mxu0 %v366_v38  ;;  %403 = vmatpush.msrb.mxu1 %v367_v39 }
  0x29   : > { %322 = vmatpush.msra.mxu2 %v287_v22  ;;  %342 = vmatpush.msra.mxu3 %v303_v23 }
  0x2a   : > { %384 = vmatpush.msrb.mxu0 %v364_v40  ;;  %404 = vmatpush.msrb.mxu1 %v365_v41 }
  0x2b   : > { %323 = vmatpush.msra.mxu2 %v286_v24  ;;  %343 = vmatpush.msra.mxu3 %v302_v25 }
  0x2c   : > { %385 = vmatpush.msrb.mxu0 %v362_v42  ;;  %405 = vmatpush.msrb.mxu1 %v363_v43 }
  0x2d   : > { %324 = vmatpush.msra.mxu2 %v285_v26  ;;  %344 = vmatpush.msra.mxu3 %v301_v27 }
  0x2e   : > { %386 = vmatpush.msrb.mxu0 %v360_v44  ;;  %406 = vmatpush.msrb.mxu1 %v361_v45 }
  0x2f   : > { %325 = vmatpush.msra.mxu2 %v284_v28  ;;  %345 = vmatpush.msra.mxu3 %v300_v29 }
  0x30   : > { %387 = vmatpush.msrb.mxu0 %v358_v51  ;;  %407 = vmatpush.msrb.mxu1 %v359_v52 }
  0x31   : > { %326 = vmatpush.msra.mxu2 %v283_v30  ;;  %346 = vmatpush.msra.mxu3 %v299_v31 }
  0x32   : > { %388 = vmatpush.msrb.mxu0 %v356_v53  ;;  %408 = vmatpush.msrb.mxu1 %v357_v54 }
  0x33   : > { %327 = vmatpush.msra.mxu2 %v282_v32  ;;  %347 = vmatpush.msra.mxu3 %v298_v33 }
  0x34   : > { %389 = vmatpush.msrb.mxu0 %v354_v55  ;;  %409 = vmatpush.msrb.mxu1 %v355_v56 }
  0x35   : > { %328 = vmatpush.msra.mxu2 %v281_v34  ;;  %348 = vmatpush.msra.mxu3 %v297_v35 }
  0xa1   : > { %v258_v47 = vpop.f32.mrf.mxu0  ;;  %v278_v48 = vpop.f32.mrf.mxu1 }
  0xa2   : > { %v259_v49 = vadd.f32 %v258_v47, %v227_v46  ;;  %v279_v50 = vadd.f32 %v278_v48, %v227_v46 }
  0xa4   : > { %329 = vmatmul.f32.vlgmr.msra.gmra.mxu2 %v259_v49  ;;  %349 = vmatmul.f32.vlgmr.msra.gmra.mxu3 %v279_v50 }
 0x127   : > { %v330_v57 = vpop.f32.mrf.mxu2  ;;  %v350_v58 = vpop.f32.mrf.mxu3 }
 0x128   : > { %v351_v59 = vadd.f32 %v350_v58, %v330_v57 }
 0x12a   : > { %v353_v60 = vmax.f32 %v351_v59, 0.0 }
 0x12c   : > { %548 = vmatmul.msk.f32.vlgmr.msrb.gmra.mxu0 %vm370_vm2, %v353_v60  ;;  %549 = vmatmul.msk.f32.vlgmr.msrb.gmra.mxu1 %vm370_vm2, %v353_v60 }
 0x1a9   : > { %v391_v61 = vpop.f32.mrf.mxu0  ;;  %v411_v62 = vpop.f32.mrf.mxu1 }
 0x1aa   : > { %v550_v63 = vmul.f32 -1.442695, %v391_v61  ;;  %v551_v0 = vmul.f32 -1.442695, %v411_v62 }
 0x1ac   : > { %598 = vpow2.f32 %v550_v63 }
 0x1ad   : > { %600 = vpow2.f32 %v551_v0 }
 0x1b2   : > { %v599_v1 = vpop.eup %598 }
 0x1b3   : > { %v601_v2 = vpop.eup %600  ;;  %v420_v3 = vadd.f32 1.0, %v599_v1 }
 0x1b4   : > { %v421_v4 = vadd.f32 1.0, %v601_v2 }
 0x1b5   : > { %602 = vrcp.f32 %v420_v3  ;;  %v433_v13 = vand.u32 2147483648, %v420_v3  ;;  %v431_v16 = vand.u32 2147483647, %v420_v3  ;;  %vm427_vm5 = vweird.f32 %v420_v3 }
 0x1b6   : > { %604 = vrcp.f32 %v421_v4  ;;  %v448_v14 = vand.u32 2147483648, %v421_v4  ;;  %v446_v17 = vand.u32 2147483647, %v421_v4  ;;  %vm442_vm7 = vweird.f32 %v421_v4 }
 0x1b7   : > { %v434_v20 = vor.u32 1.1754944e-38, %v433_v13  ;;  %vm432_vm9 = vcmp.eq.f32.partialorder %v431_v16, 8.507059e+37 }
 0x1b8   : > { %v449_v21 = vor.u32 1.1754944e-38, %v448_v14  ;;  %vm447_vm10 = vcmp.eq.f32.partialorder %v446_v17, 8.507059e+37 }
 0x1bb   : > { %v603_v5 = vpop.eup %602 }
 0x1bc   : > { %v605_v6 = vpop.eup %604  ;;  %v423_v7 = vmul.f32 %v603_v5, %v420_v3  ;;  %vm428_vm3 = vweird.f32 %v603_v5 }
 0x1bd   : > { %v438_v9 = vmul.f32 %v605_v6, %v421_v4  ;;  %vm443_vm4 = vweird.f32 %v605_v6  ;;  %vm429_vm6 = vmor %vm427_vm5, %vm428_vm3 }
 0x1be   : > { %v424_v10 = vsub.f32 1.0, %v423_v7  ;;  %vm444_vm8 = vmor %vm442_vm7, %vm443_vm4 }
 0x1bf   : > { %v439_v11 = vsub.f32 1.0, %v438_v9 }
 0x1c0   : > { %v425_v12 = vmul.f32 %v603_v5, %v424_v10 }
 0x1c1   : > { %v440_v15 = vmul.f32 %v605_v6, %v439_v11 }
 0x1c2   : > { %v426_v18 = vadd.f32 %v603_v5, %v425_v12 }
 0x1c3   : > { %v441_v19 = vadd.f32 %v605_v6, %v440_v15 }
 0x1c4   : > { %v430_v22 = vsel %vm429_vm6, %v603_v5, %v426_v18 }
 0x1c5   : > { %v445_v23 = vsel %vm444_vm8, %v605_v6, %v441_v19  ;;  %v435_v24 = vsel %vm432_vm9, %v434_v20, %v430_v22 }
 0x1c6   : > { %v450_v25 = vsel %vm447_vm10, %v449_v21, %v445_v23  ;;  %v452_v27 = vperm.slane %v435_v24, 0 }
 0x1c7   : > { %v453_v26 = vperm.slane %v450_v25, 0 }
 0x1c9   : > { %v456_v28 = vrot.slane %v453_v26, 4 }
 0x1cb   : > { %v457_v29 = vsel %vm236_vm0, %v452_v27, %v456_v28 }
 0x1cc   : > { %v459_v30 = vmul.f32 %v457_v29, %v780_v8 }
 0x1ce   : > { %460 = vst [vmem:[%s218_s14] sm:$0xff] %v459_v30 }
 0x1cf   : > { %633 = shalt.err (!%p630_p3)
}
 0x1d0   : > { %559 = dma.vmem_to_hbm [thread:$0]  (%p741_p5), %s476_s2, 128, %s478_s15, %s462_s16  }
 0x1d1 PF: > { %p565_p4 = scmp.ge.s32.totalorder %s668_s23, 2  ;;  %s489_s7 = sand.u32 1, %s656_s20  }
 0x1d2   : > { %s490_s8 = scalar_lea.sflag [#allocation4], %s489_s7 }
 0x1d3   : > { %p562_p7 = pnand %p565_p4, %p745_p6 }
 0x1d5   : > { %p563_p8 = pneg %p562_p7 }
 0x1d7   : > { %651 = dma.done.wait (%p563_p8), %s490_s8, 128  }
 0x1d8   : > { %653 = vsyncadd (%p563_p8), %s490_s8, 4294967168  ;;  %p16_p9 = scmp.ge.s32.totalorder %s728_s25, 4   ;;  %s954_s20 = smov %s660_s21 }
 0x1d9   : > { %s955_s21 = smov %s664_s22  ;;  %s956_s22 = smov %s739_s28 }
 0x1da   : > { %s957_s23 = smov %s728_s25  ;;  %18 = sbr.rel (!%p16_p9) target bundleno = 5 (0x5), region = 75 }
 0x1df   :  { %496 = vsyncpa [#allocation4], 1 }
 0x1e0   :  { %498 = vsyncpa [#allocation4 + $0x1], 1 }

</bundles_post_ra>
